<compile_context>
chip_gen: v7x
topology: tpu7x:2x2x1
jax: 0.10.0
libtpu: 0.0.40
codegen_flags: <defaults>
</compile_context>

<pallas_src>
import functools
from typing import NamedTuple

import jax
import jax.numpy as jnp
from jax import lax
from jax.experimental import pallas as pl
from jax.experimental.pallas import tpu as pltpu


class Dims(NamedTuple):
    L: int       # num_labels
    H: int       # hidden_size
    S: int       # num_slots
    R_W3: int    # row offset of the output-head weight block in the param slab
    R_B3: int    # row offset of the output-head bias row in the param slab
    P: int       # output / logits lane width (>= L + S + 2, multiple of 128)
    W_ACT: int   # activation-slab lane width == W1 row count (multiple of 128)


def _round_up(x, m):
    return ((x + m - 1) // m) * m


def _grudst_kernel(act_ref, prm_ref, out_ref, *, L, H, S, R_W3, R_B3):
    f32 = jnp.float32
    B, W_ACT = act_ref.shape
    P = out_ref.shape[1]
    WL = prm_ref.shape[1] // 2          # lanes of the [h0 | gi] half of pass-1 output

    act = act_ref[...]                  # (B, W_ACT)  [targets | 1 | x_last | x_turn | pad]

    # ---- MXU pass 1 (bias folded via the constant-1 activation lane) ----
    w1 = prm_ref[0:W_ACT, :]                                   # (W_ACT, 2*WL)
    p1 = jnp.dot(act, w1, preferred_element_type=f32)          # (B, 2*WL)
    left = p1[:, :WL]                   # [h0 | gi_r | gi_z | gi_n | pad]
    right = p1[:, WL:]                  # [ 0 | gh_r | gh_z | gh_n | pad]  (same offsets)

    # PyTorch GRU cell (gate order r, z, n):
    h0 = left[:, :H]
    rz = jax.nn.sigmoid(left[:, H:3 * H] + right[:, H:3 * H])  # r and z in one EUP batch
    r = rz[:, :H]
    z = rz[:, H:]
    n = jnp.tanh(left[:, 3 * H:4 * H] + r * right[:, 3 * H:4 * H])
    h = n + z * (h0 - n)                # == (1 - z) * n + z * h0

    # ---- MXU pass 2: both output heads in one lane-dense matmul ----
    w3 = prm_ref[R_W3:R_W3 + H, :P]                            # (H, P)  [w_bs | w_sg | 0]
    b3 = prm_ref[R_B3:R_B3 + 1, :P]                            # (1, P)
    logits = jnp.dot(h, w3, preferred_element_type=f32) + b3   # (B, P)

    # ---- BCE from logits: single softplus per element, PyTorch-style -100 clamp ----
    y = act[:, :P]                      # lanes 0..L+S-1 are the targets, rest is masked off
    sp = jnp.maximum(-logits, 0.0) + jnp.log(1.0 + jnp.exp(-jnp.abs(logits)))  # softplus(-lg)
    a = jnp.minimum(sp, 100.0)          # = -max(log sigmoid(lg), -100)
    b = jnp.minimum(sp + logits, 100.0)  # = -max(log(1 - sigmoid(lg)), -100)
    term = b + y * (a - b)              # = -(y*logp + (1-y)*log1mp), per element

    lane = lax.broadcasted_iota(jnp.int32, (B, P), 1)
    loss_bs = jnp.sum(jnp.where(lane < L, term, 0.0)) * (1.0 / (B * L))
    loss_sg = jnp.sum(jnp.where((lane >= L) & (lane < L + S), term, 0.0)) * (1.0 / (B * S))

    # ---- Single lane-dense output slab: [bs probs | sg probs | loss_bs | loss_sg | pad] ----
    probs = jax.nn.sigmoid(logits)
    row0 = lax.broadcasted_iota(jnp.int32, (B, P), 0) == 0
    out = jnp.where(row0 & (lane == L + S), loss_bs, probs)
    out = jnp.where(row0 & (lane == L + S + 1), loss_sg, out)
    out_ref[...] = out.astype(out_ref.dtype)


def pack_params(p):
    """Host-side one-time packing of PyTorch-shaped params into a single (rows, 2*WL) slab."""
    L, H = p["w_in"].shape
    S = p["w_sg"].shape[1]
    f32 = jnp.float32

    W_ih = jnp.concatenate([p["w_ih_g"][g] for g in range(3)], axis=1)   # (L, 3H)
    W_hh = jnp.concatenate([p["w_hh_g"][g] for g in range(3)], axis=1)   # (H, 3H)
    b_ih = jnp.concatenate([p["b_ih_g"][g] for g in range(3)], axis=1)   # (1, 3H)
    b_hh = jnp.concatenate([p["b_hh_g"][g] for g in range(3)], axis=1)   # (1, 3H)

    # Fold the hidden-side GRU matmul (review item 1):
    #   gh = h0 @ W_hh + b_hh, h0 = last @ w_in + b_in
    #     => gh = last @ (w_in @ W_hh) + (b_in @ W_hh + b_hh)
    W_hh_fold = p["w_in"] @ W_hh                       # (L, 3H)
    b_hh_fold = p["b_in"] @ W_hh + b_hh                # (1, 3H)

    WL = _round_up(4 * H, 128)          # lanes for [h0 | gi]; gh mirrors the same offsets
    W1L = 2 * WL

    A = L + S                            # target lanes (aligned with logits)
    BIAS = A                             # constant-1 lane -> bias rows of W1
    X_LAST = A + 1
    X_TURN = A + 1 + L
    W_ACT = _round_up(A + 1 + 2 * L, 128)
    P = _round_up(L + S + 2, 128)        # +2 lanes to stash the two loss scalars
    assert P <= W_ACT and P <= W1L and X_TURN + L <= W_ACT

    # W1 rows are indexed by activation-slab lane.
    w1 = jnp.zeros((W_ACT, W1L), f32)
    b1row = jnp.zeros((1, W1L), f32)
    b1row = b1row.at[:, 0:H].set(p["b_in"])
    b1row = b1row.at[:, H:4 * H].set(b_ih)
    b1row = b1row.at[:, WL + H:WL + 4 * H].set(b_hh_fold)
    w1 = w1.at[BIAS:BIAS + 1, :].set(b1row)                       # bias via constant-1 lane
    w1 = w1.at[X_LAST:X_LAST + L, 0:H].set(p["w_in"])             # h0
    w1 = w1.at[X_LAST:X_LAST + L, WL + H:WL + 4 * H].set(W_hh_fold)   # gh (folded)
    w1 = w1.at[X_TURN:X_TURN + L, H:4 * H].set(W_ih)              # gi

    R_W3 = _round_up(W_ACT, 8)
    R_B3 = _round_up(R_W3 + H, 8)
    ROWS = _round_up(R_B3 + 1, 8)

    slab = jnp.zeros((ROWS, W1L), f32)
    slab = slab.at[0:W_ACT, :].set(w1)
    slab = slab.at[R_W3:R_W3 + H, 0:L].set(p["w_bs"])
    slab = slab.at[R_W3:R_W3 + H, L:L + S].set(p["w_sg"])
    slab = slab.at[R_B3, 0:L].set(p["b_bs"][0])
    slab = slab.at[R_B3, L:L + S].set(p["b_sg"][0])

    dims = Dims(L=L, H=H, S=S, R_W3=R_W3, R_B3=R_B3, P=P, W_ACT=W_ACT)
    return slab, dims


@functools.partial(jax.jit, static_argnames=("dims",))
def grudst_forward(last_belief_grd, turn_belief_grd, current_belief,
                   current_slot_gate, param_slab, dims):
    d = dims
    B = last_belief_grd.shape[0]
    f32 = jnp.float32

    # Single activation slab: [cur_belief | cur_slot_gate | 1.0 | last | turn | pad].
    pad = d.W_ACT - (d.L + d.S + 1 + 2 * d.L)
    parts = [current_belief.astype(f32), current_slot_gate.astype(f32),
             jnp.ones((B, 1), f32), last_belief_grd.astype(f32),
             turn_belief_grd.astype(f32)]
    if pad:
        parts.append(jnp.zeros((B, pad), f32))
    act = jnp.concatenate(parts, axis=1)                 # (B, W_ACT)

    vmem = pl.BlockSpec(memory_space=pltpu.MemorySpace.VMEM)
    kernel = functools.partial(_grudst_kernel, L=d.L, H=d.H, S=d.S,
                               R_W3=d.R_W3, R_B3=d.R_B3)

    slab = pl.pallas_call(
        kernel,
        out_shape=jax.ShapeDtypeStruct((B, d.P), jnp.float32),
        in_specs=[vmem, vmem],
        out_specs=vmem,
    )(act, param_slab)

    bs_out = slab[:, :d.L]
    sg_out = slab[:, d.L:d.L + d.S]
    loss_bs = slab[0, d.L + d.S]
    loss_sg = slab[0, d.L + d.S + 1]
    return loss_bs, loss_sg, bs_out, sg_out


def grudst_reference(last, turn, cur_belief, cur_gate, p):
    """Pure-JAX reference mirroring the PyTorch forward (unpacked, unfolded params)."""
    h0 = last @ p["w_in"] + p["b_in"]
    gi = [turn @ p["w_ih_g"][g] + p["b_ih_g"][g] for g in range(3)]
    gh = [h0 @ p["w_hh_g"][g] + p["b_hh_g"][g] for g in range(3)]
    r = jax.nn.sigmoid(gi[0] + gh[0])
    z = jax.nn.sigmoid(gi[1] + gh[1])
    n = jnp.tanh(gi[2] + r * gh[2])
    h = (1.0 - z) * n + z * h0
    bs = jax.nn.sigmoid(h @ p["w_bs"] + p["b_bs"])
    sg = jax.nn.sigmoid(h @ p["w_sg"] + p["b_sg"])

    def bce(prob, y):
        return -jnp.mean(y * jnp.maximum(jnp.log(prob), -100.0)
                         + (1.0 - y) * jnp.maximum(jnp.log(1.0 - prob), -100.0))

    return bce(bs, cur_belief), bce(sg, cur_gate), bs, sg


def init_params(key, num_labels, hidden_size, num_slots):
    """Deterministic synthetic init matching the PyTorch shapes
    (uniform +-1/sqrt(fan_in); Linear weights stored pre-transposed as (in, out))."""
    ks = jax.random.split(key, 10)
    L, H, S = num_labels, hidden_size, num_slots

    def u(k, shape, fan_in):
        bound = 1.0 / jnp.sqrt(jnp.float32(fan_in))
        return jax.random.uniform(k, shape, jnp.float32, -bound, bound)

    return {
        # input_hidden_w: Linear(L, H)
        "w_in": u(ks[0], (L, H), L),
        "b_in": u(ks[1], (1, H), L),
        # GRU(L, H): gates stacked [r, z, n]
        "w_ih_g": u(ks[2], (3, L, H), H),
        "w_hh_g": u(ks[3], (3, H, H), H),
        "b_ih_g": u(ks[4], (3, 1, H), H),
        "b_hh_g": u(ks[5], (3, 1, H), H),
        # output_bs_w: Linear(H, L)
        "w_bs": u(ks[6], (H, L), H),
        "b_bs": u(ks[7], (1, L), H),
        # output_slotgate_w: Linear(H, S)
        "w_sg": u(ks[8], (H, S), H),
        "b_sg": u(ks[9], (1, S), H),
    }


if __name__ == "__main__":
    B = 8            # batch
    NUM_LABELS = 32  # conf['num_labels']
    HIDDEN = 32      # conf['hidden_size']
    NUM_SLOTS = 16   # conf['num_slots']

    root = jax.random.PRNGKey(0)
    k_param, k_last, k_turn, k_cb, k_cg = jax.random.split(root, 5)

    params = init_params(k_param, NUM_LABELS, HIDDEN, NUM_SLOTS)
    param_slab, dims = pack_params(params)   # host-side one-time packing (incl. pass-2 fold)

    last_belief_grd = jax.random.uniform(k_last, (B, NUM_LABELS), jnp.float32)
    turn_belief_grd = jax.random.uniform(k_turn, (B, NUM_LABELS), jnp.float32)
    current_belief = jax.random.uniform(k_cb, (B, NUM_LABELS), jnp.float32)
    current_slot_gate = jax.random.uniform(k_cg, (B, NUM_SLOTS), jnp.float32)
    # NOTE: last_belief_pred / turn_belief_pred are unused by the PyTorch forward -> omitted.

    loss_bs, loss_sg, bs_out, sg_out = jax.block_until_ready(
        grudst_forward(last_belief_grd, turn_belief_grd, current_belief,
                       current_slot_gate, param_slab, dims=dims))

    # Cross-check against a pure-JAX reference of the same math (unfolded params).
    r_loss_bs, r_loss_sg, r_bs, r_sg = grudst_reference(
        last_belief_grd, turn_belief_grd, current_belief, current_slot_gate, params)

    assert jnp.allclose(loss_bs, r_loss_bs, atol=1e-4), (loss_bs, r_loss_bs)
    assert jnp.allclose(loss_sg, r_loss_sg, atol=1e-4), (loss_sg, r_loss_sg)
    assert jnp.allclose(bs_out, r_bs, atol=1e-4)
    assert jnp.allclose(sg_out, r_sg, atol=1e-4)

    print("KERNEL_OK")
</pallas_src>

<mosaic_0001>
module attributes {stable_mosaic.version = 11 : i64} {
  func.func @_grudst_kernel(%arg0: memref<8x128xf32, #tpu.memory_space<vmem>>, %arg1: memref<168x256xf32, #tpu.memory_space<vmem>>, %arg2: memref<8x128xf32, #tpu.memory_space<vmem>>) attributes {dimension_semantics = [], scalar_prefetch = 0 : i64, scratch_operands = 0 : i64, tpu.core_type = #tpu.core_type<tc>} {
    %c0 = arith.constant 0 : index
    %c0_0 = arith.constant 0 : index
    %0 = vector.load %arg0[%c0, %c0_0] : memref<8x128xf32, #tpu.memory_space<vmem>>, vector<8x128xf32>
    %c0_1 = arith.constant 0 : index
    %c0_2 = arith.constant 0 : index
    %1 = vector.load %arg1[%c0_1, %c0_2] : memref<168x256xf32, #tpu.memory_space<vmem>>, vector<128x256xf32>
    %cst = arith.constant dense<0.000000e+00> : vector<8x256xf32>
    %2 = tpu.matmul %0, %1, %cst {dimension_numbers = #tpu.dot_dimension_numbers<[1], [0], [0], [1], [0, 0, 1, 1], [], []>} : vector<8x128xf32>, vector<128x256xf32>, vector<8x256xf32> -> vector<8x256xf32>
    %3 = vector.extract_strided_slice %2 {offsets = [0, 0], sizes = [8, 128], strides = [1, 1]} : vector<8x256xf32> to vector<8x128xf32>
    %4 = vector.extract_strided_slice %2 {offsets = [0, 128], sizes = [8, 128], strides = [1, 1]} : vector<8x256xf32> to vector<8x128xf32>
    %5 = vector.extract_strided_slice %3 {offsets = [0, 0], sizes = [8, 32], strides = [1, 1]} : vector<8x128xf32> to vector<8x32xf32>
    %6 = vector.extract_strided_slice %3 {offsets = [0, 32], sizes = [8, 64], strides = [1, 1]} : vector<8x128xf32> to vector<8x64xf32>
    %7 = vector.extract_strided_slice %4 {offsets = [0, 32], sizes = [8, 64], strides = [1, 1]} : vector<8x128xf32> to vector<8x64xf32>
    %8 = arith.addf %6, %7 : vector<8x64xf32>
    %9 = arith.negf %8 : vector<8x64xf32>
    %10 = math.exp %9 : vector<8x64xf32>
    %cst_3 = arith.constant 1.000000e+00 : f32
    %11 = vector.broadcast %cst_3 : f32 to vector<8x64xf32>
    %12 = arith.addf %11, %10 : vector<8x64xf32>
    %13 = arith.divf %11, %12 : vector<8x64xf32>
    %14 = vector.extract_strided_slice %13 {offsets = [0, 0], sizes = [8, 32], strides = [1, 1]} : vector<8x64xf32> to vector<8x32xf32>
    %15 = vector.extract_strided_slice %13 {offsets = [0, 32], sizes = [8, 32], strides = [1, 1]} : vector<8x64xf32> to vector<8x32xf32>
    %16 = vector.extract_strided_slice %3 {offsets = [0, 96], sizes = [8, 32], strides = [1, 1]} : vector<8x128xf32> to vector<8x32xf32>
    %17 = vector.extract_strided_slice %4 {offsets = [0, 96], sizes = [8, 32], strides = [1, 1]} : vector<8x128xf32> to vector<8x32xf32>
    %18 = arith.mulf %14, %17 : vector<8x32xf32>
    %19 = arith.addf %16, %18 : vector<8x32xf32>
    %20 = math.tanh %19 : vector<8x32xf32>
    %21 = arith.subf %5, %20 : vector<8x32xf32>
    %22 = arith.mulf %15, %21 : vector<8x32xf32>
    %23 = arith.addf %20, %22 : vector<8x32xf32>
    %c128 = arith.constant 128 : index
    %c0_4 = arith.constant 0 : index
    %24 = vector.load %arg1[%c128, %c0_4] : memref<168x256xf32, #tpu.memory_space<vmem>>, vector<32x128xf32>
    %c160 = arith.constant 160 : index
    %c0_5 = arith.constant 0 : index
    %25 = vector.load %arg1[%c160, %c0_5] : memref<168x256xf32, #tpu.memory_space<vmem>>, vector<1x128xf32>
    %cst_6 = arith.constant dense<0.000000e+00> : vector<8x128xf32>
    %26 = tpu.matmul %23, %24, %cst_6 {dimension_numbers = #tpu.dot_dimension_numbers<[1], [0], [0], [1], [0, 0, 1, 1], [], []>} : vector<8x32xf32>, vector<32x128xf32>, vector<8x128xf32> -> vector<8x128xf32>
    %27 = vector.broadcast %25 : vector<1x128xf32> to vector<8x128xf32>
    %28 = arith.addf %26, %27 : vector<8x128xf32>
    %cst_7 = arith.constant 0.000000e+00 : f32
    %29 = vector.broadcast %cst_7 : f32 to vector<8x128xf32>
    %30 = arith.subf %29, %28 : vector<8x128xf32>
    %cst_8 = arith.constant 0.000000e+00 : f32
    %31 = vector.broadcast %cst_8 : f32 to vector<8x128xf32>
    %32 = arith.maximumf %30, %31 : vector<8x128xf32>
    %33 = math.absf %28 : vector<8x128xf32>
    %cst_9 = arith.constant 0.000000e+00 : f32
    %34 = vector.broadcast %cst_9 : f32 to vector<8x128xf32>
    %35 = arith.subf %34, %33 : vector<8x128xf32>
    %36 = math.exp %35 : vector<8x128xf32>
    %cst_10 = arith.constant 1.000000e+00 : f32
    %37 = vector.broadcast %cst_10 : f32 to vector<8x128xf32>
    %38 = arith.addf %37, %36 : vector<8x128xf32>
    %39 = math.log %38 : vector<8x128xf32>
    %40 = arith.addf %32, %39 : vector<8x128xf32>
    %cst_11 = arith.constant 1.000000e+02 : f32
    %41 = vector.broadcast %cst_11 : f32 to vector<8x128xf32>
    %42 = arith.minimumf %40, %41 : vector<8x128xf32>
    %43 = arith.addf %40, %28 : vector<8x128xf32>
    %cst_12 = arith.constant 1.000000e+02 : f32
    %44 = vector.broadcast %cst_12 : f32 to vector<8x128xf32>
    %45 = arith.minimumf %43, %44 : vector<8x128xf32>
    %46 = arith.subf %42, %45 : vector<8x128xf32>
    %47 = arith.mulf %0, %46 : vector<8x128xf32>
    %48 = arith.addf %45, %47 : vector<8x128xf32>
    %49 = tpu.iota {dimensions = array<i32: 1>} : vector<8x128xi32>
    %c32_i32 = arith.constant 32 : i32
    %50 = vector.broadcast %c32_i32 : i32 to vector<8x128xi32>
    %51 = arith.cmpi slt, %49, %50 : vector<8x128xi32>
    %cst_13 = arith.constant 0.000000e+00 : f32
    %52 = vector.broadcast %cst_13 : f32 to vector<8x128xf32>
    %53 = arith.select %51, %48, %52 : vector<8x128xi1>, vector<8x128xf32>
    %54 = vector.shape_cast %53 : vector<8x128xf32> to vector<1x8x128xf32>
    %cst_14 = arith.constant dense<0.000000e+00> : vector<1xf32>
    %55 = vector.multi_reduction <add>, %54, %cst_14 [1, 2] : vector<1x8x128xf32> to vector<1xf32>
    %56 = vector.shape_cast %55 : vector<1xf32> to vector<1x1x1xf32>
    %57 = vector.extract %56[0, 0, 0] : f32 from vector<1x1x1xf32>
    %cst_15 = arith.constant 3.906250e-03 : f32
    %58 = arith.mulf %57, %cst_15 : f32
    %c32_i32_16 = arith.constant 32 : i32
    %59 = vector.broadcast %c32_i32_16 : i32 to vector<8x128xi32>
    %60 = arith.cmpi sge, %49, %59 : vector<8x128xi32>
    %c48_i32 = arith.constant 48 : i32
    %61 = vector.broadcast %c48_i32 : i32 to vector<8x128xi32>
    %62 = arith.cmpi slt, %49, %61 : vector<8x128xi32>
    %63 = arith.andi %60, %62 : vector<8x128xi1>
    %cst_17 = arith.constant 0.000000e+00 : f32
    %64 = vector.broadcast %cst_17 : f32 to vector<8x128xf32>
    %65 = arith.select %63, %48, %64 : vector<8x128xi1>, vector<8x128xf32>
    %66 = vector.shape_cast %65 : vector<8x128xf32> to vector<1x8x128xf32>
    %cst_18 = arith.constant dense<0.000000e+00> : vector<1xf32>
    %67 = vector.multi_reduction <add>, %66, %cst_18 [1, 2] : vector<1x8x128xf32> to vector<1xf32>
    %68 = vector.shape_cast %67 : vector<1xf32> to vector<1x1x1xf32>
    %69 = vector.extract %68[0, 0, 0] : f32 from vector<1x1x1xf32>
    %cst_19 = arith.constant 7.812500e-03 : f32
    %70 = arith.mulf %69, %cst_19 : f32
    %71 = arith.negf %28 : vector<8x128xf32>
    %72 = math.exp %71 : vector<8x128xf32>
    %cst_20 = arith.constant 1.000000e+00 : f32
    %73 = vector.broadcast %cst_20 : f32 to vector<8x128xf32>
    %74 = arith.addf %73, %72 : vector<8x128xf32>
    %75 = arith.divf %73, %74 : vector<8x128xf32>
    %76 = tpu.iota {dimensions = array<i32: 0>} : vector<8x128xi32>
    %c0_i32 = arith.constant 0 : i32
    %77 = vector.broadcast %c0_i32 : i32 to vector<8x128xi32>
    %78 = arith.cmpi eq, %76, %77 : vector<8x128xi32>
    %c48_i32_21 = arith.constant 48 : i32
    %79 = vector.broadcast %c48_i32_21 : i32 to vector<8x128xi32>
    %80 = arith.cmpi eq, %49, %79 : vector<8x128xi32>
    %81 = arith.andi %78, %80 : vector<8x128xi1>
    %82 = vector.broadcast %58 : f32 to vector<8x128xf32>
    %83 = arith.select %81, %82, %75 : vector<8x128xi1>, vector<8x128xf32>
    %c49_i32 = arith.constant 49 : i32
    %84 = vector.broadcast %c49_i32 : i32 to vector<8x128xi32>
    %85 = arith.cmpi eq, %49, %84 : vector<8x128xi32>
    %86 = arith.andi %78, %85 : vector<8x128xi1>
    %87 = vector.broadcast %70 : f32 to vector<8x128xf32>
    %88 = arith.select %86, %87, %83 : vector<8x128xi1>, vector<8x128xf32>
    %c0_22 = arith.constant 0 : index
    %c0_23 = arith.constant 0 : index
    %89 = vector.load %arg2[%c0_22, %c0_23] : memref<8x128xf32, #tpu.memory_space<vmem>>, vector<8x128xf32>
    tpu.vector_store %arg2[%c0_22, %c0_23], %88 {strides = array<i32>} : memref<8x128xf32, #tpu.memory_space<vmem>>, vector<8x128xf32>,
    return
  }
}

</mosaic_0001>

<bundles_post_ra>
// kernel: grudst_forward.1
= control target key start
LH: loop header
LB: loop body
LE: loop exit
PB: predicated region body
PF: predicated region fallthrough
CT: control target
= control target key end

     0   :  { %7 = vsyncpa [#allocation3], 0  ;;  %s417_s9 = smov [#allocation2]   ;;  %s464_s0 = inlined_call_operand.vmem [shape: f32[8,128], index: 0, kind: input, shape index: {}]   ;;  %s465_s1 = inlined_call_operand.hbm [shape: f32[168,256], index: 1, kind: input, shape index: {}]   ;;  %s466_s2 = inlined_call_operand.vmem [shape: f32[8,128], index: 2, kind: output, shape index: {}]  }
   0x1   :  { %s15_s10 = sshll.u32 %s417_s9, 4  ;;  %s393_s13 = scalar_lea.hbm %s465_s1, 5376  ;;  %s16_s10 = int_to_ptr.vmem [resolvable:$true] %s15_s10 }
   0x2   :  { %p394_p0 = scmp.ne.s32.totalorder %s465_s1, %s393_s13  ;;  %p397_p1 = scmp.lt.u32.totalorder %s393_s13, %s465_s1 }
   0x4   :  { %p399_p2 = pnand %p397_p1, %p394_p0 }
   0x6   :  { %402 = shalt.err (!%p399_p2)
}
   0x7   :  { %s403_s18 = scalar_lea.vmem %s16_s10, 5376  ;;  %p408_p4 = scmp.lt.s32.totalorder %s16_s10, %s16_s10 }
   0x8   :  { %p404_p3 = scmp.ne.s32.totalorder %s16_s10, %s403_s18  ;;  %p409_p5 = scmp.lt.s32.totalorder %s403_s18, %s403_s18 }
   0xa   :  { %p410_p6 = por %p409_p5, %p408_p4 }
   0xc   :  { %p411_p7 = pnand %p410_p6, %p404_p3 }
   0xe   :  { %414 = shalt.err (!%p411_p7)
}
   0xf   :  { %s418_s19 = smov 256   ;;  %s419_s20 = smov 16  }
  0x10   :  { %21 = dma.hbm_to_vmem [thread:$0]  %s465_s1, 5376, %s16_s10, [#allocation3], %s418_s19, %s418_s19, %s419_s20  }
  0x11   :  { %415 = dma.done.wait [#allocation3], 5376  }
  0x12   :  { %416 = vsyncadd [#allocation3], 4294961920  ;;  %v420_v0 = vmov 0.0   ;;  %v27_v1 = vld [vmem:[#allocation2 + $0x8] sm:$0xff]  ;;  %v29_v2 = vld [vmem:[#allocation2 + $0x18] sm:$0xff]  ;;  %s421_s24 = smov 64  }
  0x13   :  { %122 = vmatprep.mubr.f32.mxu0 %v420_v0  ;;  %v26_v3 = vld [vmem:[#allocation2] sm:$0xff]  ;;  %v329_v4 = vpack.c.bf16 %v29_v2, %v27_v1  ;;  %v28_v5 = vld [vmem:[#allocation2 + $0x10] sm:$0xff]  ;;  %v31_v6 = vld [vmem:[#allocation2 + $0x28] sm:$0xff]  ;;  %vm424_vm0 = vmmov 0   ;;  %vm170_vm1 = vcmask 261120  }
  0x14   :  { %v33_v7 = vld [vmem:[#allocation2 + $0x38] sm:$0xff]  ;;  %v331_v8 = vpack.c.bf16 %v28_v5, %v26_v3  ;;  %v30_v10 = vld [vmem:[#allocation2 + $0x20] sm:$0xff]  ;;  %v32_v11 = vld [vmem:[#allocation2 + $0x30] sm:$0xff]  ;;  %326 = vmatprep.mubr.msk.f32.mxu1 %vm424_vm0, %v420_v0 }
  0x15   :  { %v333_v9 = vpack.c.bf16 %v33_v7, %v31_v6  ;;  %v35_v12 = vld [vmem:[#allocation2 + $0x48] sm:$0xff]  ;;  %330 = vmatprep.subr.bf16.mxu0 %v329_v4  ;;  %v37_v13 = vld [vmem:[#allocation2 + $0x58] sm:$0xff]  ;;  %v335_v14 = vpack.c.bf16 %v32_v11, %v30_v10  ;;  %v34_v16 = vld [vmem:[#allocation2 + $0x40] sm:$0xff]  ;;  %v423_v4 = vmov 0.0|0.0  }
  0x16   :  { %332 = vmatpush1.bf16.msra.mxu0 %v331_v8  ;;  %v337_v15 = vpack.c.bf16 %v37_v13, %v35_v12  ;;  %v36_v17 = vld [vmem:[#allocation2 + $0x50] sm:$0xff]  ;;  %v39_v18 = vld [vmem:[#allocation2 + $0x68] sm:$0xff]  ;;  %v41_v19 = vld [vmem:[#allocation2 + $0x78] sm:$0xff]  ;;  %361 = vmatprep.subr.bf16.mxu1 %v423_v4 }
  0x17   :  { %334 = vmatprep.subr.bf16.mxu0 %v333_v9  ;;  %v339_v20 = vpack.c.bf16 %v36_v17, %v34_v16  ;;  %v341_v21 = vpack.c.bf16 %v41_v19, %v39_v18  ;;  %v38_v22 = vld [vmem:[#allocation2 + $0x60] sm:$0xff]  ;;  %v40_v23 = vld [vmem:[#allocation2 + $0x70] sm:$0xff]  ;;  %v43_v24 = vld [vmem:[#allocation2 + $0x88] sm:$0xff] }
  0x18   :  { %v45_v25 = vld [vmem:[#allocation2 + $0x98] sm:$0xff]  ;;  %v343_v26 = vpack.c.bf16 %v40_v23, %v38_v22  ;;  %v42_v28 = vld [vmem:[#allocation2 + $0x80] sm:$0xff]  ;;  %v44_v29 = vld [vmem:[#allocation2 + $0x90] sm:$0xff] }
  0x19   :  { %v345_v27 = vpack.c.bf16 %v45_v25, %v43_v24  ;;  %v47_v30 = vld [vmem:[#allocation2 + $0xa8] sm:$0xff]  ;;  %v49_v31 = vld [vmem:[#allocation2 + $0xb8] sm:$0xff]  ;;  %v347_v32 = vpack.c.bf16 %v44_v29, %v42_v28  ;;  %v46_v34 = vld [vmem:[#allocation2 + $0xa0] sm:$0xff]  ;;  %v259_v25 = vlaneseq }
  0x1a   :  { %336 = vmatpush1.bf16.msra.mxu0 %v335_v14  ;;  %v349_v33 = vpack.c.bf16 %v49_v31, %v47_v30  ;;  %v48_v35 = vld [vmem:[#allocation2 + $0xb0] sm:$0xff]  ;;  %v51_v36 = vld [vmem:[#allocation2 + $0xc8] sm:$0xff]  ;;  %v53_v37 = vld [vmem:[#allocation2 + $0xd8] sm:$0xff] }
  0x1b   :  { %338 = vmatprep.subr.bf16.mxu0 %v337_v15  ;;  %v351_v38 = vpack.c.bf16 %v48_v35, %v46_v34  ;;  %v353_v39 = vpack.c.bf16 %v53_v37, %v51_v36  ;;  %v50_v40 = vld [vmem:[#allocation2 + $0xc0] sm:$0xff]  ;;  %v52_v41 = vld [vmem:[#allocation2 + $0xd0] sm:$0xff]  ;;  %v55_v42 = vld [vmem:[#allocation2 + $0xe8] sm:$0xff]  ;;  %v260_v28 = vand.u32 127, %v259_v25 }
  0x1c   :  { %v57_v43 = vld [vmem:[#allocation2 + $0xf8] sm:$0xff]  ;;  %v355_v44 = vpack.c.bf16 %v52_v41, %v50_v40  ;;  %v54_v46 = vld [vmem:[#allocation2 + $0xe0] sm:$0xff]  ;;  %v56_v47 = vld [vmem:[#allocation2 + $0xf0] sm:$0xff] }
  0x1d   :  { %v357_v45 = vpack.c.bf16 %v57_v43, %v55_v42  ;;  %v359_v48 = vpack.c.bf16 %v56_v47, %v54_v46  ;;  %v456_v49 = vld [vmem:[%s464_s0] sm:$0xff]  ;;  %s422_s0 = smov 32   ;;  %v163_v2 = vld [vmem:[#allocation2 + $0x110] sm:$0xff]  ;;  %vm273_vm2 = vcmp.ge.s32.totalorder %v260_v28, 32  ;;  %vm274_vm3 = vcmp.lt.s32.totalorder %v260_v28, 48 }
  0x1e   :  { %340 = vmatpush1.bf16.msra.mxu0 %v339_v20  ;;  %v162_v1 = vld [vmem:[#allocation2 + $0x100] sm:$0xff]  ;;  %v165_v6 = vld [vmem:[#allocation2 + $0x130] sm:$0xff]  ;;  %vm275_vm4 = vmand %vm273_vm2, %vm274_vm3  ;;  %vm261_vm5 = vcmp.lt.s32.totalorder %v260_v28, 32  ;;  %vm296_vm7 = vcmp.eq.s32.totalorder %v260_v28, 48  ;;  %vm300_vm8 = vcmp.eq.s32.totalorder %v260_v28, 49 }
  0x1f   :  { %342 = vmatprep.subr.bf16.mxu0 %v341_v21  ;;  %v164_v3 = vld [vmem:[#allocation2 + $0x120] sm:$0xff]  ;;  %v362_v5 = vpack.c.bf16 %v163_v2, %v162_v1 }
  0x20   :  { %v365_v7 = vpack.c.bf16 %v165_v6, %v164_v3  ;;  %v166_v13 = vld [vmem:[#allocation2 + $0x140] ss:$0 sm:$0xff] }
  0x21   :  { %363 = vmatpush3.bf16.msra.mxu1 %v362_v5 }
  0x22   :  { %344 = vmatpush1.bf16.msra.mxu0 %v343_v26  ;;  %364 = vmatprep.subr.bf16.mxu1 %v423_v4 }
  0x23   :  { %346 = vmatprep.subr.bf16.mxu0 %v345_v27 }
  0x25   :  { %366 = vmatpush3.bf16.msra.mxu1 %v365_v7 }
  0x26   :  { %348 = vmatpush1.bf16.msra.mxu0 %v347_v32 }
  0x27   :  { %350 = vmatprep.subr.bf16.mxu0 %v349_v33 }
  0x2a   :  { %352 = vmatpush1.bf16.msra.mxu0 %v351_v38 }
  0x2b   :  { %354 = vmatprep.subr.bf16.mxu0 %v353_v39 }
  0x2e   :  { %356 = vmatpush1.bf16.msra.mxu0 %v355_v44 }
  0x2f   :  { %358 = vmatprep.subr.bf16.mxu0 %v357_v45 }
  0x32   :  { %360 = vmatpush1.bf16.msra.mxu0 %v359_v48 }
  0x35   :  { %123 = vmatmul.mubr.f32.vlgmr.msra.gmra.mrb[0].mxu0 %v456_v49 }
 0x108   :  { %v124_v50 = vpop.f32.mrb[0].mxu0 }
 0x109   :  { %v126_v51 = vpop.f32.mrb[1].mxu0 }
 0x10a   :  { %v129_v52 = vadd.f32 %v126_v51, %v124_v50  ;;  %137 = vrot.lane.b32.xlu0 %v126_v51, %s421_s24 }
 0x10c   :  { %v310_v53 = vmul.f32 -1.442695, %v129_v52 }
 0x10e   :  { %379 = vpow2.f32 %v310_v53  ;;  %v294_v53 = vshrl.u32 %v259_v25, 7 }
 0x110   :  { %vm295_vm6 = vcmp.eq.s32.totalorder %v294_v53, 0 }
 0x111   :  { %vm297_vm9 = vmand %vm295_vm6, %vm296_vm7 }
 0x112   :  { %vm301_vm10 = vmand %vm295_vm6, %vm300_vm8 }
 0x118   :  { %v380_v54 = vpop.eup %379 }
 0x119   :  { %v133_v55 = vadd.f32 1.0, %v380_v54 }
 0x11b   :  { %381 = vrcp.f32 %v133_v55 }
 0x125   :  { %v382_v56 = vpop.eup %381 }
 0x17c   :  { %v138_v57 = vpop.permute.xlu0 %137 }
 0x17d   :  { %v140_v58 = vmul.f32 %v382_v56, %v138_v57 }
 0x17f   :  { %142 = vrot.lane.b32.xlu0 %v140_v58, %s421_s24 }
 0x1f1   :  { %v143_v59 = vpop.permute.xlu0 %142 }
 0x1f2   :  { %v145_v60 = vadd.f32 %v143_v59, %v124_v50 }
 0x1f4   :  { %383 = vtanh.f32 %v145_v60 }
 0x1fe   :  { %v384_v61 = vpop.eup %383 }
 0x1ff   :  { %148 = vrot.lane.b32.xlu1 %v384_v61, %s422_s0 }
 0x271   :  { %v149_v62 = vpop.permute.xlu1 %148 }
 0x272   :  { %v151_v63 = vsub.f32 %v124_v50, %v149_v62 }
 0x274   :  { %153 = vrot.lane.b32.xlu1 %v151_v63, %s421_s24 }
 0x2e6   :  { %v154_v8 = vpop.permute.xlu1 %153 }
 0x2e7   :  { %v156_v9 = vmul.f32 %v382_v56, %v154_v8 }
 0x2e9   :  { %158 = vrot.lane.b32.xlu0 %v156_v9, %s422_s0 }
 0x35b   :  { %v159_v10 = vpop.permute.xlu0 %158 }
 0x35c   :  { %v161_v11 = vadd.f32 %v384_v61, %v159_v10 }
 0x35e   :  { %168 = vrot.lane.b32.xlu1 %v161_v11, %s422_s0 }
 0x3d0   :  { %v169_v12 = vpop.permute.xlu1 %168 }
 0x3d1   :  { %327 = vmatmul.mubr.msk.f32.vlgmr.msra.gmra.mrb[0].mxu1 %vm170_vm1, %v169_v12 }
 0x4a4   :  { %v239_v14 = vpop.f32.mrb[0].mxu1 }
 0x4a5   :  { %v240_v15 = vadd.f32 %v239_v14, %v166_v13  ;;  %v328_v16 = vpop.f32.mrb[1].mxu1 }
 0x4a7   :  { %v245_v17 = vand.u32 2147483647, %v240_v15  ;;  %v243_v21 = vsub.f32 0.0, %v240_v15  ;;  %v312_v50 = vmul.f32 -1.442695, %v240_v15 }
 0x4a9   :  { %v246_v18 = vsub.f32 0.0, %v245_v17  ;;  %v244_v23 = vmax.f32 %v243_v21, 0.0 }
 0x4ab   :  { %v247_v0 = vmul.f32 1.442695, %v246_v18 }
 0x4ad   :  { %385 = vpow2.f32 %v247_v0 }
 0x4b7   :  { %v386_v19 = vpop.eup %385 }
 0x4b8   :  { %v249_v20 = vadd.f32 1.0, %v386_v19 }
 0x4ba   :  { %387 = vlog2.f32 %v249_v20 }
 0x4bb   :  { %389 = vpow2.f32 %v312_v50 }
 0x4c4   :  { %v388_v22 = vpop.eup %387 }
 0x4c5   :  { %v251_v24 = vmul.f32 0.6931472, %v388_v22  ;;  %v390_v51 = vpop.eup %389 }
 0x4c6   :  { %v290_v52 = vadd.f32 1.0, %v390_v51 }
 0x4c7   :  { %v252_v26 = vadd.f32 %v251_v24, %v244_v23 }
 0x4c8   :  { %391 = vrcp.f32 %v290_v52 }
 0x4c9   :  { %v254_v27 = vadd.f32 %v252_v26, %v240_v15  ;;  %v253_v29 = vmin.f32 %v252_v26, 100.0 }
 0x4cb   :  { %v255_v30 = vmin.f32 %v254_v27, 100.0 }
 0x4cd   :  { %v256_v31 = vsub.f32 %v253_v29, %v255_v30 }
 0x4cf   :  { %v257_v32 = vmul.f32 %v256_v31, %v456_v49 }
 0x4d1   :  { %v258_v33 = vadd.f32 %v257_v32, %v255_v30 }
 0x4d2   :  { %v392_v54 = vpop.eup %391 }
 0x4d3   :  { %v276_v34 = vsel %vm275_vm4, %v258_v33, 0.0  ;;  %v262_v35 = vsel %vm261_vm5, %v258_v33, 0.0 }
 0x4d4   :  { %277 = vadd.xlane.f32.xlu1 %v276_v34  ;;  %263 = vadd.xlane.f32.xlu0 %v262_v35 }
 0x561   :  { %v278_v36 = vpop.xlane.xlu1 %277  ;;  %v264_v37 = vpop.xlane.xlu0 %263 }
 0x562   :  { %v279_v38 = vrot.slane %v278_v36, 4  ;;  %v265_v39 = vrot.slane %v264_v37, 4 }
 0x564   :  { %v280_v40 = vadd.f32 %v279_v38, %v278_v36  ;;  %v266_v41 = vadd.f32 %v265_v39, %v264_v37 }
 0x566   :  { %v281_v42 = vrot.slane %v280_v40, 2  ;;  %v267_v43 = vrot.slane %v266_v41, 2 }
 0x568   :  { %v282_v44 = vadd.f32 %v281_v42, %v280_v40  ;;  %v268_v45 = vadd.f32 %v267_v43, %v266_v41 }
 0x56a   :  { %v269_v46 = vrot.slane %v268_v45, 1  ;;  %v283_v47 = vrot.slane %v282_v44, 1 }
 0x56c   :  { %v270_v48 = vadd.f32 %v269_v46, %v268_v45  ;;  %v284_v49 = vadd.f32 %v283_v47, %v282_v44 }
 0x56e   :  { %367 = vpush %v270_v48 }
 0x56f   :  { %369 = vpush %v284_v49 }
 0x59f   :  { %s368_s25 = spop %367 }
 0x5a0   :  { %s272_s26 = smul.f32 0.00390625, %s368_s25  ;;  %s370_s27 = spop %369 }
 0x5a1   :  { %s286_s28 = smul.f32 0.0078125, %s370_s27 }
 0x5a2   :  { %v298_v55 = vstv %s272_s26 }
 0x5a3   :  { %v299_v56 = vsel %vm297_vm9, %v298_v55, %v392_v54  ;;  %v302_v57 = vstv %s286_s28 }
 0x5a4   :  { %v303_v58 = vsel %vm301_vm10, %v302_v57, %v299_v56 }
 0x5a5   :  { %304 = vst [vmem:[%s466_s2] sm:$0xff] %v303_v58 }
 0x5a6   :  { %309 = vsyncpa [#allocation3], 1 }

</bundles_post_ra>
